<compile_context>
chip_gen: v7x
topology: tpu7x:2x2x1
jax: 0.10.0
libtpu: 0.0.40
codegen_flags: <defaults>
</compile_context>

<pallas_src>
import functools

import jax
import jax.numpy as jnp
from jax.experimental import pallas as pl
from jax.experimental.pallas import tpu as pltpu

HIDDEN = 32
NUM_RELATIONS = 8
NUM_CATEGORIES = 4          # ['food', 'service', 'ambiance', 'price']
NUM_CLASSES = 3             # final sentiment classifier
DRP_W, AFML_W, INSTR_W = 0.4, 0.3, 0.3

OUT_LANES = 128             # packed, lane-dense output slab width

# ---- column offsets inside the packed [HIDDEN, 384] bf16 weight matrix ----
_PW = 0                          # pairwise first layers [simWa|divWa|simWb|divWb] : 4H
_Q1 = _PW + 4 * HIDDEN           # query-side first layers [aa|ac|ta|tb|tc]        : 5H
_REL = _Q1 + 5 * HIDDEN          # averaged relation-propagation weight            : H
_F2 = _REL + HIDDEN              # instruction fusion, second layer                : H
_CF = _F2 + HIDDEN               # [category (4) | final (3)] classifier columns   : 7
_W32_COLS = 12 * HIDDEN          # = 384 (padded to a multiple of 128 lanes)


# ----------------------------------------------------------------------------
# Fused per-episode kernel
# ----------------------------------------------------------------------------

def _pad2d(v, rows, cols):
    """Zero-pad a small [r, c] register value up to [rows, cols] (static sizes)."""
    r, c = v.shape
    if c < cols:
        v = jnp.concatenate([v, jnp.zeros((r, cols - c), jnp.float32)], axis=1)
    if r < rows:
        v = jnp.concatenate([v, jnp.zeros((rows - r, cols), jnp.float32)], axis=0)
    return v


def _fused_kernel(x_ref, w32_ref, wsec_ref, small_ref, sc_ref, o_ref, *, S, Q):
    H = HIDDEN
    N = S + Q

    x = x_ref[...]                      # [N, H] f32: support rows then query rows
    qry = x[S:, :]                      # [Q, H]

    # ---------------- DualRelationsPropagation: pairwise sim/div ----------------
    # score(i, j) = w2 . relu(Wa x_i + Wb x_j + b1) + b2 ; 0 on the diagonal.
    # sim & div are lane-packed: one [N, N, 2H] broadcast/relu serves both encoders.
    wp = w32_ref[:, _PW:_PW + 4 * H].astype(jnp.float32)                # [H, 4H]
    proj = jnp.dot(x, wp, preferred_element_type=jnp.float32)            # [N, 4H]
    a_pair = proj[:, 0:2 * H]                # [sim_a | div_a]
    b_pair = proj[:, 2 * H:4 * H]            # [sim_b | div_b]
    b1_pair = small_ref[1:2, 0:2 * H]        # [1, 2H]  = [simB1 | divB1]
    w2_pair = small_ref[1:2, 2 * H:4 * H]    # [1, 2H]  = [simW2 | divW2]

    h = jnp.maximum(a_pair[:, None, :] + b_pair[None, :, :] + b1_pair[None, :, :], 0.0)
    hw = h * w2_pair[None, :, :]                                         # [N, N, 2H]
    s_sim = jnp.sum(hw[:, :, 0:H], axis=-1) + sc_ref[0]                  # [N, N]
    s_div = jnp.sum(hw[:, :, H:2 * H], axis=-1) + sc_ref[1]

    ri = jax.lax.broadcasted_iota(jnp.int32, (N, N), 0)
    ci = jax.lax.broadcasted_iota(jnp.int32, (N, N), 1)
    diag = ri == ci
    sim_m = jnp.where(diag, 0.0, s_sim)
    div_m = jnp.where(diag, 0.0, s_div)

    # relation propagation (exact fold of the 8 linear relation layers);
    # only the query rows feed any returned output.
    w_rel = w32_ref[:, _REL:_REL + H].astype(jnp.float32)
    drp_query = (jnp.dot(qry, w_rel, preferred_element_type=jnp.float32)
                 + small_ref[2:3, 0:H])                                  # [Q, H]

    # ------------- AFML + instruction templates: 5 MLPs packed -------------
    wq1 = w32_ref[:, _Q1:_Q1 + 5 * H].astype(jnp.float32)                # [H, 5H]
    h1 = jnp.maximum(jnp.dot(qry, wq1, preferred_element_type=jnp.float32)
                     + small_ref[0:1, 0:5 * H], 0.0)                     # [Q, 5H]
    # Folded second layers: cols 0:H -> afml (aa2 + ac2); cols H:2H -> fusion pre-activation.
    h2 = jnp.dot(h1, wsec_ref[...].astype(jnp.float32),
                 preferred_element_type=jnp.float32)                     # [Q, 2H]
    afml_query = h2[:, 0:H] + small_ref[2:3, H:2 * H]
    f1 = jnp.maximum(h2[:, H:2 * H] + small_ref[2:3, 2 * H:3 * H], 0.0)
    w_f2 = w32_ref[:, _F2:_F2 + H].astype(jnp.float32)
    instr_query = (jnp.dot(f1, w_f2, preferred_element_type=jnp.float32)
                   + small_ref[2:3, 3 * H:4 * H])                        # [Q, H]

    combined = DRP_W * drp_query + AFML_W * afml_query + INSTR_W * instr_query

    # -------- fused category + final classifiers: one [2Q, H] @ [H, 7] dot --------
    w_cf = w32_ref[:, _CF:_CF + NUM_CATEGORIES + NUM_CLASSES].astype(jnp.float32)
    stacked = jnp.concatenate([afml_query, combined], axis=0)            # [2Q, H]
    cf = jnp.dot(stacked, w_cf, preferred_element_type=jnp.float32)      # [2Q, 7]
    category_logits = cf[0:Q, 0:NUM_CATEGORIES] + small_ref[3:4, 0:NUM_CATEGORIES]
    query_logits = (cf[Q:2 * Q, NUM_CATEGORIES:NUM_CATEGORIES + NUM_CLASSES]
                    + small_ref[3:4, NUM_CATEGORIES:NUM_CATEGORIES + NUM_CLASSES])

    # ---------------- one unmasked, lane-dense [N, 128] store ----------------
    qblk = _pad2d(query_logits, N, 8)
    cblk = _pad2d(category_logits, N, 8)
    pieces = [sim_m, div_m, qblk, cblk]
    rest = OUT_LANES - 2 * N - 16
    if rest > 0:
        pieces.append(jnp.zeros((N, rest), jnp.float32))
    o_ref[...] = jnp.concatenate(pieces, axis=1)


# ----------------------------------------------------------------------------
# Parameter initialization (deterministic, synthetic) + packing
# ----------------------------------------------------------------------------

def init_params(key):
    keys = iter(jax.random.split(key, 64))
    H = HIDDEN

    def lin(in_d, out_d):
        """PyTorch-layout Linear params: W [out, in], b [out]."""
        k1, k2 = jax.random.split(next(keys))
        w = jax.random.normal(k1, (out_d, in_d), jnp.float32) / jnp.sqrt(float(in_d))
        b = jax.random.normal(k2, (out_d,), jnp.float32) * 0.02
        return w, b

    # --- DRP ---
    simW1, simB1 = lin(2 * H, H)
    simW2, simB2 = lin(H, 1)
    divW1, divB1 = lin(2 * H, H)
    divW2, divB2 = lin(H, 1)
    rel = [lin(H, H) for _ in range(NUM_RELATIONS)]
    relW_avg = jnp.mean(jnp.stack([w for w, _ in rel]), axis=0)   # [H, H]
    relB_avg = jnp.mean(jnp.stack([b for _, b in rel]), axis=0)   # [H]
    # drp.aspect_projector: declared but never used on this forward path.

    # --- AFML ---
    aaW1, aaB1 = lin(H, H); aaW2, aaB2 = lin(H, H)
    acW1, acB1 = lin(H, H); acW2, acB2 = lin(H, H)
    catW, catB = lin(H, NUM_CATEGORIES)
    # knowledge_integrator: unused on the external_knowledge=None path.

    # --- Instruction prompts (templates a, b, c + fusion) ---
    tW1, tB1, tW2, tB2 = [], [], [], []
    for _ in range(3):
        w1, b1 = lin(H, H); w2, b2 = lin(H, H)
        tW1.append(w1); tB1.append(b1); tW2.append(w2); tB2.append(b2)
    fuW1, fuB1 = lin(3 * H, H)
    fuW2, fuB2 = lin(H, H)

    # --- Final classifier ---
    finW, finB = lin(H, NUM_CLASSES)

    # ------------------------------ packing ------------------------------
    # All weights with a HIDDEN-row input dimension -> one [H, 384] matrix (bf16).
    w32 = jnp.zeros((H, _W32_COLS), jnp.float32)
    pair = jnp.concatenate([simW1[:, :H].T, divW1[:, :H].T,
                            simW1[:, H:].T, divW1[:, H:].T], axis=1)     # [H, 4H]
    w32 = w32.at[:, _PW:_PW + 4 * H].set(pair)
    q1 = jnp.concatenate([aaW1.T, acW1.T] + [w.T for w in tW1], axis=1)  # [H, 5H]
    w32 = w32.at[:, _Q1:_Q1 + 5 * H].set(q1)
    w32 = w32.at[:, _REL:_REL + H].set(relW_avg.T)
    w32 = w32.at[:, _F2:_F2 + H].set(fuW2.T)
    w32 = w32.at[:, _CF:_CF + NUM_CATEGORIES].set(catW.T)
    w32 = w32.at[:, _CF + NUM_CATEGORIES:_CF + NUM_CATEGORIES + NUM_CLASSES].set(finW.T)

    # Folded second layers [5H, 2H]:
    #   cols 0:H  <- aaW2 / acW2 (afml aa+ac summed via shared output columns)
    #   cols H:2H <- template second layers folded into the fusion first layer:
    #                M_t = tW2_t.T @ fuW1_t.T   (no activation between them -> exact)
    wsec = jnp.zeros((5 * H, 2 * H), jnp.float32)
    wsec = wsec.at[0:H, 0:H].set(aaW2.T)
    wsec = wsec.at[H:2 * H, 0:H].set(acW2.T)
    for t in range(3):
        fu1_t = fuW1[:, t * H:(t + 1) * H]           # [H, H]
        M_t = tW2[t].T @ fu1_t.T                     # [H, H]
        wsec = wsec.at[(2 + t) * H:(3 + t) * H, H:2 * H].set(M_t)

    b_afml2 = aaB2 + acB2
    b_f1fold = fuB1 + sum(fuW1[:, t * H:(t + 1) * H] @ tB2[t] for t in range(3))

    # Bias / small-vector matrix (f32, stays f32 for accuracy).
    small = jnp.zeros((8, 5 * H), jnp.float32)
    small = small.at[0, 0:5 * H].set(jnp.concatenate([aaB1, acB1] + tB1))
    small = small.at[1, 0:2 * H].set(jnp.concatenate([simB1, divB1]))
    small = small.at[1, 2 * H:4 * H].set(jnp.concatenate([simW2[0], divW2[0]]))
    small = small.at[2, 0:H].set(relB_avg)
    small = small.at[2, H:2 * H].set(b_afml2)
    small = small.at[2, 2 * H:3 * H].set(b_f1fold)
    small = small.at[2, 3 * H:4 * H].set(fuB2)
    small = small.at[3, 0:NUM_CATEGORIES].set(catB)
    small = small.at[3, NUM_CATEGORIES:NUM_CATEGORIES + NUM_CLASSES].set(finB)

    scalars = jnp.array([simB2[0], divB2[0]], jnp.float32)   # SMEM scalar biases

    params = {'w32': w32.astype(jnp.bfloat16),
              'wsec': wsec.astype(jnp.bfloat16),
              'small': small,
              'scalars': scalars}

    # Raw (PyTorch-layout) weights kept only for the pure-JAX reference check.
    ref = dict(simW1=simW1, simB1=simB1, simW2=simW2, simB2=simB2,
               divW1=divW1, divB1=divB1, divW2=divW2, divB2=divB2,
               rel=rel,
               aa=(aaW1, aaB1, aaW2, aaB2), ac=(acW1, acB1, acW2, acB2),
               catW=catW, catB=catB,
               tmpl=[(tW1[t], tB1[t], tW2[t], tB2[t]) for t in range(3)],
               fuW1=fuW1, fuB1=fuB1, fuW2=fuW2, fuB2=fuB2,
               finW=finW, finB=finB)
    return params, ref


# ----------------------------------------------------------------------------
# Forward passes: single pallas_call over an episode grid; free JAX unpacking.
# ----------------------------------------------------------------------------

def few_shot_absa_forward_batched(params, support_emb, support_labels, query_emb,
                                  external_knowledge=None):
    """support_emb [E,S,H], query_emb [E,Q,H] -> per-episode output dict."""
    del support_labels          # unused by compute (as in PyTorch propagate_relations)
    del external_knowledge      # None path: knowledge_integrator never applied

    E, S, H = support_emb.shape
    Q = query_emb.shape[1]
    N = S + Q
    assert H == HIDDEN
    assert N % 8 == 0 and 2 * N + 16 <= OUT_LANES and Q <= N

    # Concatenate support|query once here (free in XLA); the kernel just row-slices.
    x_all = jnp.concatenate([support_emb, query_emb], axis=1).reshape(E * N, H)

    slab = pl.pallas_call(
        functools.partial(_fused_kernel, S=S, Q=Q),
        out_shape=jax.ShapeDtypeStruct((E * N, OUT_LANES), jnp.float32),
        grid=(E,),
        in_specs=[
            pl.BlockSpec((N, HIDDEN), lambda e: (e, 0)),             # per-episode block
            pl.BlockSpec((HIDDEN, _W32_COLS), lambda e: (0, 0)),     # weights: VMEM-resident
            pl.BlockSpec((5 * HIDDEN, 2 * HIDDEN), lambda e: (0, 0)),
            pl.BlockSpec((8, 5 * HIDDEN), lambda e: (0, 0)),
            pl.BlockSpec(memory_space=pltpu.MemorySpace.SMEM),       # 2 scalar biases
        ],
        out_specs=pl.BlockSpec((N, OUT_LANES), lambda e: (e, 0)),
        compiler_params=pltpu.CompilerParams(
            dimension_semantics=("parallel",)),                      # v7x: shard across 2 TCs
    )(x_all, params['w32'], params['wsec'], params['small'], params['scalars'])

    slab = slab.reshape(E, N, OUT_LANES)
    sim = slab[:, :, 0:N]
    div = slab[:, :, N:2 * N]
    qlog = slab[:, :Q, 2 * N:2 * N + NUM_CLASSES]
    clog = slab[:, :Q, 2 * N + 8:2 * N + 8 + NUM_CATEGORIES]
    return {'query_logits': qlog,          # [E, num_query, 3]
            'similarity_matrix': sim,      # [E, N, N]
            'diversity_matrix': div,       # [E, N, N]
            'category_logits': clog}       # [E, num_query, 4]


def few_shot_absa_forward(params, support_emb, support_labels, query_emb,
                          external_knowledge=None):
    """Single-episode forward (same signature/semantics as the PyTorch module)."""
    labels_b = None if support_labels is None else support_labels[None]
    out = few_shot_absa_forward_batched(params, support_emb[None], labels_b,
                                        query_emb[None], external_knowledge)
    return {k: v[0] for k, v in out.items()}


# ----------------------------------------------------------------------------
# Pure-JAX f32 reference (mirrors the PyTorch forward, external_knowledge=None)
# ----------------------------------------------------------------------------

def _reference_forward(ref, support_emb, query_emb):
    H = HIDDEN
    x = jnp.concatenate([support_emb, query_emb], axis=0)
    N = x.shape[0]
    S = support_emb.shape[0]

    def enc2(v, w1, b1, w2, b2):
        return jnp.maximum(v @ w1.T + b1, 0.0) @ w2.T + b2

    def pair(w1, b1, w2, b2):
        a = x @ w1[:, :H].T
        b = x @ w1[:, H:].T
        h = jnp.maximum(a[:, None, :] + b[None, :, :] + b1, 0.0)
        s = h @ w2[0] + b2[0]
        return s * (1.0 - jnp.eye(N))

    sim = pair(ref['simW1'], ref['simB1'], ref['simW2'], ref['simB2'])
    div = pair(ref['divW1'], ref['divB1'], ref['divW2'], ref['divB2'])

    prop = jnp.mean(jnp.stack([x @ w.T + b for w, b in ref['rel']], axis=1), axis=1)
    drp_q = prop[S:]

    q = query_emb
    afml_q = enc2(q, *ref['aa']) + enc2(q, *ref['ac'])
    cat_logits = afml_q @ ref['catW'].T + ref['catB']
    t_out = [enc2(q, *ref['tmpl'][t]) for t in range(3)]
    fused = enc2(jnp.concatenate(t_out, axis=-1),
                 ref['fuW1'], ref['fuB1'], ref['fuW2'], ref['fuB2'])
    combined = DRP_W * drp_q + AFML_W * afml_q + INSTR_W * fused
    q_logits = combined @ ref['finW'].T + ref['finB']
    return {'query_logits': q_logits, 'similarity_matrix': sim,
            'diversity_matrix': div, 'category_logits': cat_logits}


# ----------------------------------------------------------------------------
# Main
# ----------------------------------------------------------------------------

if __name__ == "__main__":
    key = jax.random.PRNGKey(0)
    k_params, k_sup, k_qry, k_lab, k_bat = jax.random.split(key, 5)

    num_support, num_query = 4, 4
    params, ref = init_params(k_params)

    support_embeddings = jax.random.normal(k_sup, (num_support, HIDDEN), jnp.float32)
    query_embeddings = jax.random.normal(k_qry, (num_query, HIDDEN), jnp.float32)
    support_labels = jax.random.randint(k_lab, (num_support,), 0, NUM_CLASSES, jnp.int32)

    forward = jax.jit(few_shot_absa_forward)
    out = jax.block_until_ready(
        forward(params, support_embeddings, support_labels, query_embeddings))

    assert out['query_logits'].shape == (num_query, NUM_CLASSES)
    assert out['similarity_matrix'].shape == (num_support + num_query,) * 2
    assert out['diversity_matrix'].shape == (num_support + num_query,) * 2
    assert out['category_logits'].shape == (num_query, NUM_CATEGORIES)

    # Correctness vs a pure-JAX f32 reference (bf16 weight storage -> ~1e-2 drift).
    ref_out = _reference_forward(ref, support_embeddings, query_embeddings)
    for name in out:
        err = float(jnp.max(jnp.abs(out[name] - ref_out[name])))
        assert err < 0.1, (name, err)

    # Batched-episode path: grid over episodes, weights stay VMEM-resident.
    E = 4
    sup_b = jnp.concatenate(
        [support_embeddings[None],
         jax.random.normal(k_bat, (E - 1, num_support, HIDDEN), jnp.float32)], axis=0)
    qry_b = jnp.concatenate(
        [query_embeddings[None],
         jax.random.normal(jax.random.fold_in(k_bat, 1),
                           (E - 1, num_query, HIDDEN), jnp.float32)], axis=0)
    lab_b = jnp.tile(support_labels[None], (E, 1))
    fwd_b = jax.jit(few_shot_absa_forward_batched)
    out_b = jax.block_until_ready(fwd_b(params, sup_b, lab_b, qry_b))
    assert out_b['query_logits'].shape == (E, num_query, NUM_CLASSES)
    assert bool(jnp.allclose(out_b['similarity_matrix'][0], out['similarity_matrix'], atol=1e-5))
    assert bool(jnp.allclose(out_b['query_logits'][0], out['query_logits'], atol=1e-5))

    print("KERNEL_OK")
</pallas_src>

<mosaic_0001>
module attributes {stable_mosaic.version = 11 : i64} {
  func.func @_fused_kernel(%arg0: i32, %arg1: memref<8x32xf32, #tpu.memory_space<vmem>>, %arg2: memref<32x384xbf16, #tpu.memory_space<vmem>>, %arg3: memref<160x64xbf16, #tpu.memory_space<vmem>>, %arg4: memref<8x160xf32, #tpu.memory_space<vmem>>, %arg5: memref<2xf32, #tpu.memory_space<smem>>, %arg6: memref<8x128xf32, #tpu.memory_space<vmem>>) attributes {dimension_semantics = [#tpu.dimension_semantics<parallel>], iteration_bounds = array<i64: 1>, scalar_prefetch = 0 : i64, scratch_operands = 0 : i64, tpu.core_type = #tpu.core_type<tc>, window_params = [{transform_indices = @transform_0, window_bounds = array<i64: 8, 32>}, {pipeline_mode = #tpu.pipeline_mode<synchronous>, transform_indices = @transform_1, window_bounds = array<i64: 32, 384>}, {pipeline_mode = #tpu.pipeline_mode<synchronous>, transform_indices = @transform_2, window_bounds = array<i64: 160, 64>}, {pipeline_mode = #tpu.pipeline_mode<synchronous>, transform_indices = @transform_3, window_bounds = array<i64: 8, 160>}, {transform_indices = @transform_4, window_bounds = array<i64: 2>}, {transform_indices = @transform_5, window_bounds = array<i64: 8, 128>}]} {
    %c0 = arith.constant 0 : index
    %c0_0 = arith.constant 0 : index
    %0 = vector.load %arg1[%c0, %c0_0] : memref<8x32xf32, #tpu.memory_space<vmem>>, vector<8x32xf32>
    %1 = vector.extract_strided_slice %0 {offsets = [4, 0], sizes = [4, 32], strides = [1, 1]} : vector<8x32xf32> to vector<4x32xf32>
    %c0_1 = arith.constant 0 : index
    %c0_2 = arith.constant 0 : index
    %2 = vector.load %arg2[%c0_1, %c0_2] : memref<32x384xbf16, #tpu.memory_space<vmem>>, vector<32x128xbf16>
    %3 = arith.extf %2 : vector<32x128xbf16> to vector<32x128xf32>
    %cst = arith.constant dense<0.000000e+00> : vector<8x128xf32>
    %4 = tpu.matmul %0, %3, %cst {dimension_numbers = #tpu.dot_dimension_numbers<[1], [0], [0], [1], [0, 0, 1, 1], [], []>} : vector<8x32xf32>, vector<32x128xf32>, vector<8x128xf32> -> vector<8x128xf32>
    %5 = vector.extract_strided_slice %4 {offsets = [0, 0], sizes = [8, 64], strides = [1, 1]} : vector<8x128xf32> to vector<8x64xf32>
    %6 = vector.extract_strided_slice %4 {offsets = [0, 64], sizes = [8, 64], strides = [1, 1]} : vector<8x128xf32> to vector<8x64xf32>
    %c1 = arith.constant 1 : index
    %c0_3 = arith.constant 0 : index
    %7 = vector.load %arg4[%c1, %c0_3] : memref<8x160xf32, #tpu.memory_space<vmem>>, vector<1x64xf32>
    %c1_4 = arith.constant 1 : index
    %c64 = arith.constant 64 : index
    %8 = vector.load %arg4[%c1_4, %c64] : memref<8x160xf32, #tpu.memory_space<vmem>>, vector<1x64xf32>
    %9 = vector.shape_cast %5 : vector<8x64xf32> to vector<8x1x64xf32>
    %10 = vector.shape_cast %6 : vector<8x64xf32> to vector<1x8x64xf32>
    %11 = vector.broadcast %9 : vector<8x1x64xf32> to vector<8x8x64xf32>
    %12 = vector.broadcast %10 : vector<1x8x64xf32> to vector<8x8x64xf32>
    %13 = arith.addf %11, %12 : vector<8x8x64xf32>
    %14 = vector.shape_cast %7 : vector<1x64xf32> to vector<1x1x64xf32>
    %15 = vector.broadcast %14 : vector<1x1x64xf32> to vector<8x8x64xf32>
    %16 = arith.addf %13, %15 : vector<8x8x64xf32>
    %cst_5 = arith.constant 0.000000e+00 : f32
    %17 = vector.broadcast %cst_5 : f32 to vector<8x8x64xf32>
    %18 = arith.maximumf %16, %17 : vector<8x8x64xf32>
    %19 = vector.shape_cast %8 : vector<1x64xf32> to vector<1x1x64xf32>
    %20 = vector.broadcast %19 : vector<1x1x64xf32> to vector<8x8x64xf32>
    %21 = arith.mulf %18, %20 : vector<8x8x64xf32>
    %22 = vector.extract_strided_slice %21 {offsets = [0, 0, 0], sizes = [8, 8, 32], strides = [1, 1, 1]} : vector<8x8x64xf32> to vector<8x8x32xf32>
    %cst_6 = arith.constant dense<0.000000e+00> : vector<8x8xf32>
    %23 = vector.multi_reduction <add>, %22, %cst_6 [2] : vector<8x8x32xf32> to vector<8x8xf32>
    %c0_7 = arith.constant 0 : index
    %24 = memref.load %arg5[%c0_7] : memref<2xf32, #tpu.memory_space<smem>>
    %25 = vector.broadcast %24 : f32 to vector<8x8xf32>
    %26 = arith.addf %23, %25 : vector<8x8xf32>
    %27 = vector.extract_strided_slice %21 {offsets = [0, 0, 32], sizes = [8, 8, 32], strides = [1, 1, 1]} : vector<8x8x64xf32> to vector<8x8x32xf32>
    %cst_8 = arith.constant dense<0.000000e+00> : vector<8x8xf32>
    %28 = vector.multi_reduction <add>, %27, %cst_8 [2] : vector<8x8x32xf32> to vector<8x8xf32>
    %c1_9 = arith.constant 1 : index
    %29 = memref.load %arg5[%c1_9] : memref<2xf32, #tpu.memory_space<smem>>
    %30 = vector.broadcast %29 : f32 to vector<8x8xf32>
    %31 = arith.addf %28, %30 : vector<8x8xf32>
    %32 = tpu.iota {dimensions = array<i32: 0>} : vector<8x8xi32>
    %33 = tpu.iota {dimensions = array<i32: 1>} : vector<8x8xi32>
    %34 = arith.cmpi eq, %32, %33 : vector<8x8xi32>
    %cst_10 = arith.constant 0.000000e+00 : f32
    %35 = vector.broadcast %cst_10 : f32 to vector<8x8xf32>
    %36 = arith.select %34, %35, %26 : vector<8x8xi1>, vector<8x8xf32>
    %cst_11 = arith.constant 0.000000e+00 : f32
    %37 = vector.broadcast %cst_11 : f32 to vector<8x8xf32>
    %38 = arith.select %34, %37, %31 : vector<8x8xi1>, vector<8x8xf32>
    %c0_12 = arith.constant 0 : index
    %c288 = arith.constant 288 : index
    %39 = vector.load %arg2[%c0_12, %c288] : memref<32x384xbf16, #tpu.memory_space<vmem>>, vector<32x32xbf16>
    %40 = arith.extf %39 : vector<32x32xbf16> to vector<32x32xf32>
    %cst_13 = arith.constant dense<0.000000e+00> : vector<4x32xf32>
    %41 = tpu.matmul %1, %40, %cst_13 {dimension_numbers = #tpu.dot_dimension_numbers<[1], [0], [0], [1], [0, 0, 1, 1], [], []>} : vector<4x32xf32>, vector<32x32xf32>, vector<4x32xf32> -> vector<4x32xf32>
    %c2 = arith.constant 2 : index
    %c0_14 = arith.constant 0 : index
    %42 = vector.load %arg4[%c2, %c0_14] : memref<8x160xf32, #tpu.memory_space<vmem>>, vector<1x32xf32>
    %43 = vector.broadcast %42 : vector<1x32xf32> to vector<4x32xf32>
    %44 = arith.addf %41, %43 : vector<4x32xf32>
    %c0_15 = arith.constant 0 : index
    %c128 = arith.constant 128 : index
    %45 = vector.load %arg2[%c0_15, %c128] : memref<32x384xbf16, #tpu.memory_space<vmem>>, vector<32x160xbf16>
    %46 = arith.extf %45 : vector<32x160xbf16> to vector<32x160xf32>
    %cst_16 = arith.constant dense<0.000000e+00> : vector<4x160xf32>
    %47 = tpu.matmul %1, %46, %cst_16 {dimension_numbers = #tpu.dot_dimension_numbers<[1], [0], [0], [1], [0, 0, 1, 1], [], []>} : vector<4x32xf32>, vector<32x160xf32>, vector<4x160xf32> -> vector<4x160xf32>
    %c0_17 = arith.constant 0 : index
    %c0_18 = arith.constant 0 : index
    %48 = vector.load %arg4[%c0_17, %c0_18] : memref<8x160xf32, #tpu.memory_space<vmem>>, vector<1x160xf32>
    %49 = vector.broadcast %48 : vector<1x160xf32> to vector<4x160xf32>
    %50 = arith.addf %47, %49 : vector<4x160xf32>
    %cst_19 = arith.constant 0.000000e+00 : f32
    %51 = vector.broadcast %cst_19 : f32 to vector<4x160xf32>
    %52 = arith.maximumf %50, %51 : vector<4x160xf32>
    %c0_20 = arith.constant 0 : index
    %c0_21 = arith.constant 0 : index
    %53 = vector.load %arg3[%c0_20, %c0_21] : memref<160x64xbf16, #tpu.memory_space<vmem>>, vector<160x64xbf16>
    %54 = arith.extf %53 : vector<160x64xbf16> to vector<160x64xf32>
    %cst_22 = arith.constant dense<0.000000e+00> : vector<4x64xf32>
    %55 = tpu.matmul %52, %54, %cst_22 {dimension_numbers = #tpu.dot_dimension_numbers<[1], [0], [0], [1], [0, 0, 1, 1], [], []>} : vector<4x160xf32>, vector<160x64xf32>, vector<4x64xf32> -> vector<4x64xf32>
    %56 = vector.extract_strided_slice %55 {offsets = [0, 0], sizes = [4, 32], strides = [1, 1]} : vector<4x64xf32> to vector<4x32xf32>
    %c2_23 = arith.constant 2 : index
    %c32 = arith.constant 32 : index
    %57 = vector.load %arg4[%c2_23, %c32] : memref<8x160xf32, #tpu.memory_space<vmem>>, vector<1x32xf32>
    %58 = vector.broadcast %57 : vector<1x32xf32> to vector<4x32xf32>
    %59 = arith.addf %56, %58 : vector<4x32xf32>
    %60 = vector.extract_strided_slice %55 {offsets = [0, 32], sizes = [4, 32], strides = [1, 1]} : vector<4x64xf32> to vector<4x32xf32>
    %c2_24 = arith.constant 2 : index
    %c64_25 = arith.constant 64 : index
    %61 = vector.load %arg4[%c2_24, %c64_25] : memref<8x160xf32, #tpu.memory_space<vmem>>, vector<1x32xf32>
    %62 = vector.broadcast %61 : vector<1x32xf32> to vector<4x32xf32>
    %63 = arith.addf %60, %62 : vector<4x32xf32>
    %cst_26 = arith.constant 0.000000e+00 : f32
    %64 = vector.broadcast %cst_26 : f32 to vector<4x32xf32>
    %65 = arith.maximumf %63, %64 : vector<4x32xf32>
    %c0_27 = arith.constant 0 : index
    %c320 = arith.constant 320 : index
    %66 = vector.load %arg2[%c0_27, %c320] : memref<32x384xbf16, #tpu.memory_space<vmem>>, vector<32x32xbf16>
    %67 = arith.extf %66 : vector<32x32xbf16> to vector<32x32xf32>
    %cst_28 = arith.constant dense<0.000000e+00> : vector<4x32xf32>
    %68 = tpu.matmul %65, %67, %cst_28 {dimension_numbers = #tpu.dot_dimension_numbers<[1], [0], [0], [1], [0, 0, 1, 1], [], []>} : vector<4x32xf32>, vector<32x32xf32>, vector<4x32xf32> -> vector<4x32xf32>
    %c2_29 = arith.constant 2 : index
    %c96 = arith.constant 96 : index
    %69 = vector.load %arg4[%c2_29, %c96] : memref<8x160xf32, #tpu.memory_space<vmem>>, vector<1x32xf32>
    %70 = vector.broadcast %69 : vector<1x32xf32> to vector<4x32xf32>
    %71 = arith.addf %68, %70 : vector<4x32xf32>
    %cst_30 = arith.constant 4.000000e-01 : f32
    %72 = vector.broadcast %cst_30 : f32 to vector<4x32xf32>
    %73 = arith.mulf %72, %44 : vector<4x32xf32>
    %cst_31 = arith.constant 3.000000e-01 : f32
    %74 = vector.broadcast %cst_31 : f32 to vector<4x32xf32>
    %75 = arith.mulf %74, %59 : vector<4x32xf32>
    %76 = arith.addf %73, %75 : vector<4x32xf32>
    %cst_32 = arith.constant 3.000000e-01 : f32
    %77 = vector.broadcast %cst_32 : f32 to vector<4x32xf32>
    %78 = arith.mulf %77, %71 : vector<4x32xf32>
    %79 = arith.addf %76, %78 : vector<4x32xf32>
    %c0_33 = arith.constant 0 : index
    %c352 = arith.constant 352 : index
    %80 = vector.load %arg2[%c0_33, %c352] : memref<32x384xbf16, #tpu.memory_space<vmem>>, vector<32x7xbf16>
    %81 = arith.extf %80 : vector<32x7xbf16> to vector<32x7xf32>
    %82 = tpu.concatenate %59, %79 in 0 : vector<4x32xf32>, vector<4x32xf32> -> vector<8x32xf32>
    %cst_34 = arith.constant dense<0.000000e+00> : vector<8x7xf32>
    %83 = tpu.matmul %82, %81, %cst_34 {dimension_numbers = #tpu.dot_dimension_numbers<[1], [0], [0], [1], [0, 0, 1, 1], [], []>} : vector<8x32xf32>, vector<32x7xf32>, vector<8x7xf32> -> vector<8x7xf32>
    %84 = vector.extract_strided_slice %83 {offsets = [0, 0], sizes = [4, 4], strides = [1, 1]} : vector<8x7xf32> to vector<4x4xf32>
    %c3 = arith.constant 3 : index
    %c0_35 = arith.constant 0 : index
    %85 = vector.load %arg4[%c3, %c0_35] : memref<8x160xf32, #tpu.memory_space<vmem>>, vector<1x4xf32>
    %86 = vector.broadcast %85 : vector<1x4xf32> to vector<4x4xf32>
    %87 = arith.addf %84, %86 : vector<4x4xf32>
    %88 = vector.extract_strided_slice %83 {offsets = [4, 4], sizes = [4, 3], strides = [1, 1]} : vector<8x7xf32> to vector<4x3xf32>
    %c3_36 = arith.constant 3 : index
    %c4 = arith.constant 4 : index
    %89 = vector.load %arg4[%c3_36, %c4] : memref<8x160xf32, #tpu.memory_space<vmem>>, vector<1x3xf32>
    %90 = vector.broadcast %89 : vector<1x3xf32> to vector<4x3xf32>
    %91 = arith.addf %88, %90 : vector<4x3xf32>
    %cst_37 = arith.constant 0.000000e+00 : f32
    %92 = vector.broadcast %cst_37 : f32 to vector<4x5xf32>
    %93 = tpu.concatenate %91, %92 in 1 : vector<4x3xf32>, vector<4x5xf32> -> vector<4x8xf32>
    %cst_38 = arith.constant 0.000000e+00 : f32
    %94 = vector.broadcast %cst_38 : f32 to vector<4x8xf32>
    %95 = tpu.concatenate %93, %94 in 0 : vector<4x8xf32>, vector<4x8xf32> -> vector<8x8xf32>
    %cst_39 = arith.constant 0.000000e+00 : f32
    %96 = vector.broadcast %cst_39 : f32 to vector<4x4xf32>
    %97 = tpu.concatenate %87, %96 in 1 : vector<4x4xf32>, vector<4x4xf32> -> vector<4x8xf32>
    %cst_40 = arith.constant 0.000000e+00 : f32
    %98 = vector.broadcast %cst_40 : f32 to vector<4x8xf32>
    %99 = tpu.concatenate %97, %98 in 0 : vector<4x8xf32>, vector<4x8xf32> -> vector<8x8xf32>
    %cst_41 = arith.constant 0.000000e+00 : f32
    %100 = vector.broadcast %cst_41 : f32 to vector<8x96xf32>
    %101 = tpu.concatenate %36, %38, %95, %99, %100 in 1 : vector<8x8xf32>, vector<8x8xf32>, vector<8x8xf32>, vector<8x8xf32>, vector<8x96xf32> -> vector<8x128xf32>
    %c0_42 = arith.constant 0 : index
    %c0_43 = arith.constant 0 : index
    %102 = vector.load %arg6[%c0_42, %c0_43] : memref<8x128xf32, #tpu.memory_space<vmem>>, vector<8x128xf32>
    tpu.vector_store %arg6[%c0_42, %c0_43], %101 {strides = array<i32>} : memref<8x128xf32, #tpu.memory_space<vmem>>, vector<8x128xf32>,
    return
  }
  func.func @transform_0(%arg0: i32) -> (i32, i32) {
    %c0_i32 = arith.constant 0 : i32
    %c0_i32_0 = arith.constant 0 : i32
    return %arg0, %c0_i32 : i32, i32
  }
  func.func @transform_1(%arg0: i32) -> (i32, i32) {
    %c0_i32 = arith.constant 0 : i32
    %c0_i32_0 = arith.constant 0 : i32
    %c0_i32_1 = arith.constant 0 : i32
    return %c0_i32, %c0_i32_0 : i32, i32
  }
  func.func @transform_2(%arg0: i32) -> (i32, i32) {
    %c0_i32 = arith.constant 0 : i32
    %c0_i32_0 = arith.constant 0 : i32
    %c0_i32_1 = arith.constant 0 : i32
    return %c0_i32, %c0_i32_0 : i32, i32
  }
  func.func @transform_3(%arg0: i32) -> (i32, i32) {
    %c0_i32 = arith.constant 0 : i32
    %c0_i32_0 = arith.constant 0 : i32
    %c0_i32_1 = arith.constant 0 : i32
    return %c0_i32, %c0_i32_0 : i32, i32
  }
  func.func @transform_4(%arg0: i32) -> i32 {
    %c0_i32 = arith.constant 0 : i32
    %c0_i32_0 = arith.constant 0 : i32
    return %c0_i32 : i32
  }
  func.func @transform_5(%arg0: i32) -> (i32, i32) {
    %c0_i32 = arith.constant 0 : i32
    %c0_i32_0 = arith.constant 0 : i32
    return %arg0, %c0_i32 : i32, i32
  }
}

</mosaic_0001>

<bundles_post_ra>
// kernel: few_shot_absa_forward.1
= control target key start
LH: loop header
LB: loop body
LE: loop exit
PB: predicated region body
PF: predicated region fallthrough
CT: control target
= control target key end

     0   :  { %10 = vsyncpa [#allocation3], 0  ;;  %s1572_s0 = inlined_call_operand.vmem [shape: f32[8,32], index: 0, kind: input, shape index: {}]   ;;  %s1573_s1 = inlined_call_operand.vmem [shape: bf16[32,384], index: 1, kind: input, shape index: {}]   ;;  %s1574_s2 = inlined_call_operand.vmem [shape: bf16[160,64], index: 2, kind: input, shape index: {}]   ;;  %s1575_s3 = inlined_call_operand.vmem [shape: f32[8,160], index: 3, kind: input, shape index: {}]   ;;  %s1576_s4 = inlined_call_operand.vmem [shape: f32[2], index: 4, kind: input, shape index: {}]   ;;  %s1577_s5 = inlined_call_operand.vmem [shape: f32[8,128], index: 5, kind: output, shape index: {}]  }
   0x1   :  { %s25_s20 = sshll.u32 %s1576_s4, 4  ;;  %s26_s20 = int_to_ptr.vmem [resolvable:$true] %s25_s20 }
   0x2   :  { %s1233_s21 = scalar_lea.vmem %s26_s20, 16  ;;  %p1238_p1 = scmp.lt.s32.totalorder %s26_s20, %s26_s20 }
   0x3   :  { %p1234_p0 = scmp.ne.s32.totalorder %s26_s20, %s1233_s21  ;;  %p1239_p2 = scmp.lt.s32.totalorder %s1233_s21, %s1233_s21 }
   0x5   :  { %p1240_p3 = por %p1239_p2, %p1238_p1 }
   0x7   :  { %p1241_p4 = pnand %p1240_p3, %p1234_p0 }
   0x9   :  { %1244 = shalt.err (!%p1241_p4)
}
   0xa   :  { %s1247_s22 = smov [#allocation2]  }
   0xb   :  { %28 = dma.vmem_to_smem %s26_s20, 16, %s1247_s22, [#allocation3]  }
   0xc   :  { %1245 = dma.done.wait [#allocation3], 16  }
   0xd   :  { %1246 = vsyncadd [#allocation3], 4294967280 }
   0xe   :  { %32 = sfence }
   0xf   :  { %v456_v0 = vld [vmem:[%s1573_s1 + $0x8] ss:$12 sps:$4 sm:$0xff]   ;;  %v458_v1 = vld [vmem:[%s1573_s1 + $0x20] ss:$12 sps:$4 sm:$0xff]   ;;  %v1248_v6 = vmov 0.0|0.0   ;;  %vm1249_vm0 = vmmov 0   ;;  %v122_v35 = vlaneseq }
  0x10   :  { %v460_v2 = vunpack.c.l.bf16 %v456_v0  ;;  %v461_v3 = vunpack.c.h.bf16 %v456_v0  ;;  %v462_v4 = vunpack.c.l.bf16 %v458_v1  ;;  %v463_v5 = vunpack.c.h.bf16 %v458_v1  ;;  %1115 = vmatprep.subr.bf16.mxu0 %v1248_v6  ;;  %v1225_v7 = vld [vmem:[%s1573_s1] ss:$12 sps:$4 sm:$0xff]   ;;  %1135 = vmatprep.subr.bf16.mxu1 %v1248_v6  ;;  %v1226_v9 = vld [vmem:[%s1573_s1 + $0x18] ss:$12 sps:$4 sm:$0xff]   ;;  %s1251_s30 = smov 96   ;;  %v1043_v15 = vld [vmem:[%s1574_s2 + $0x10] sm:$0xff]  }
  0x11   :  { %1117 = vmatpush3.bf16.msra.mxu0 %v1225_v7  ;;  %v1250_v10 = vmov 0.0   ;;  %v33_v12 = vld [vmem:[%s1572_s0] sm:$0xff]  ;;  %vm42_vm1 = vcmask 261120   ;;  %v1042_v14 = vld [vmem:[%s1574_s2 + $0x8] sm:$0xff]   ;;  %v1044_v16 = vld [vmem:[%s1574_s2 + $0x18] sm:$0xff]   ;;  %v1378_v38 = vshrl.u32 %v122_v35, 7 }
  0x12   :  { %v1303_v8 = vpack.i.bf16 %v461_v3, %v460_v2  ;;  %1118 = vmatprep.subr.bf16.mxu0 %v1248_v6  ;;  %1079 = vmatprep.mubr.msk.f32.mxu0 %vm1249_vm0, %v1250_v10  ;;  %v1313_v11 = vpack.i.bf16 %v463_v5, %v462_v4  ;;  %v1003_v13 = vld [vmem:[%s1574_s2] sm:$0xff]   ;;  %v1046_v19 = vld [vmem:[%s1574_s2 + $0x28] sm:$0xff]   ;;  %v465_v29 = vrot.slane %v33_v12, 4  ;;  %v1252_v33 = vmov 1966171168   ;;  %v1047_v36 = vld [vmem:[%s1574_s2 + $0x30] sm:$0xff]  }
  0x13   :  { %1137 = vmatpush1.bf16.msra.mxu1 %v1003_v13  ;;  %v1045_v17 = vld [vmem:[%s1574_s2 + $0x20] sm:$0xff]   ;;  %v1227_v27 = vld [vmem:[%s1573_s1 + $0x8] ss:$12 sps:$4 sm:$0xff]   ;;  %v120_v34 = vunpack.c.l.s4 %v1252_v33  ;;  %v1048_v39 = vld [vmem:[%s1574_s2 + $0x38] sm:$0xff]   ;;  %v1395_v46 = vsub.s32 0, %v1378_v38  ;;  %v574_v7 = vsub.s32 1, %v1378_v38 }
  0x14   :  { %1196 = vrot.lane.b32.xlu0 %v1303_v8, %s1251_s30  ;;  %1138 = vmatprep.subr.bf16.mxu1 %v1248_v6  ;;  %v1346_v18 = vld [vmem:[%s1575_s3 + $0x2] ss:$0 sm:$0xff]  ;;  %v1229_v30 = vld [vmem:[%s1573_s1 + $0x4] ss:$12 sps:$4 sm:$0xff]   ;;  %v1232_v32 = vld [vmem:[%s1573_s1 + $0x1c] ss:$12 sps:$4 sm:$0xff]  }
  0x15   :  { %1120 = vmatpush3.bf16.msra.mxu0 %v1226_v9  ;;  %765 = vrot.lane.b32.xlu1 %v1346_v18, %s1251_s30  ;;  %v1230_v31 = vld [vmem:[%s1573_s1 + $0x20] ss:$12 sps:$4 sm:$0xff]   ;;  %v121_v37 = vunpack.c.0.s8 %v120_v34  ;;  %s1254_s12 = smov 32   ;;  %vm868_vm2 = vcmask 1043456   ;;  %vm391_vm3 = vcmask 1041409   ;;  %vm393_vm4 = vcmask 1042434  }
  0x16   :  { %1121 = vmatprep.subr.bf16.mxu0 %v1248_v6  ;;  %v1049_v42 = vld [vmem:[%s1574_s2 + $0x40] sm:$0xff]   ;;  %v1050_v50 = vld [vmem:[%s1574_s2 + $0x48] sm:$0xff]   ;;  %s1253_s2 = smov 64   ;;  %vm395_vm5 = vcmask 1043459   ;;  %vm397_vm6 = vcmask 1044484   ;;  %s270_s15 = sld [smem:[#allocation2]] }
  0x17   :  { %1140 = vmatpush1.bf16.msra.mxu1 %v1042_v14  ;;  %v124_v40 = vsub.s32 %v121_v37, %v1378_v38  ;;  %v566_v5 = vld [vmem:[%s1575_s3] ss:$8 sm:$0x3]  ;;  %vm399_vm7 = vcmask 1045509   ;;  %vm401_vm8 = vcmask 1046534   ;;  %vm403_vm9 = vcmask 1047559  }
  0x18   :  { %1201 = vrot.lane.b32.xlu0 %v1313_v11, %s1251_s30  ;;  %1080 = vmatmul.mubr.msk.f32.vlgmr.msra.gmra.mrb[0].mxu0 %vm42_vm1, %v33_v12  ;;  %v571_v9 = vrot.slane %v566_v5, %v1395_v46  ;;  %v575_v12 = vrot.slane %v566_v5, %v574_v7  ;;  %s1255_s16 = smov 8   ;;  %s1256_s19 = smov 124   ;;  %vm961_vm11 = vcmask 23552   ;;  %vm967_vm12 = vcmask 31744  }
  0x19   :  { %1090 = vmatprep.mubr.msk.f32.mxu0 %vm1249_vm0, %v1250_v10  ;;  %1141 = vmatprep.subr.bf16.mxu1 %v1248_v6  ;;  %s1257_s20 = smov 16   ;;  %vm982_vm13 = vcmask 64512   ;;  %vm984_vm14 = vcmask 130048   ;;  %vm986_vm15 = vcmask 195584  }
  0x1a   :  { %1206 = vrot.lane.b32.xlu1 %v1303_v8, %s1253_s2 }
  0x1b   :  { %1143 = vmatpush1.bf16.msra.mxu1 %v1043_v15 }
  0x1c   :  { %1144 = vmatprep.subr.bf16.mxu1 %v1248_v6  ;;  %1211 = vrot.lane.b32.xlu0 %v1313_v11, %s1253_s2 }
  0x1f   :  { %1146 = vmatpush1.bf16.msra.mxu1 %v1044_v16 }
  0x20   :  { %1147 = vmatprep.subr.bf16.mxu1 %v1248_v6  ;;  %785 = vrot.lane.b32.xlu0 %v1346_v18, %s1254_s12 }
  0x23   :  { %1149 = vmatpush1.bf16.msra.mxu1 %v1045_v17 }
  0x24   :  { %1150 = vmatprep.subr.bf16.mxu1 %v1248_v6  ;;  %1221 = vrot.lane.b32.xlu0 %v1313_v11, %s1254_s12 }
  0x27   :  { %1152 = vmatpush1.bf16.msra.mxu1 %v1046_v19 }
  0x28   :  { %1153 = vmatprep.subr.bf16.mxu1 %v1248_v6 }
  0x2b   :  { %1155 = vmatpush1.bf16.msra.mxu1 %v1047_v36 }
  0x2c   :  { %1156 = vmatprep.subr.bf16.mxu1 %v1248_v6 }
  0x2f   :  { %1158 = vmatpush1.bf16.msra.mxu1 %v1048_v39 }
  0x30   :  { %1159 = vmatprep.subr.bf16.mxu1 %v1248_v6 }
  0x33   :  { %1161 = vmatpush1.bf16.msra.mxu1 %v1049_v42 }
  0x34   :  { %1162 = vmatprep.subr.bf16.mxu1 %v1248_v6 }
  0x37   :  { %1164 = vmatpush1.bf16.msra.mxu1 %v1050_v50 }
  0x86   :  { %v1197_v20 = vpop.permute.xlu0 %1196 }
  0x87   :  { %v1199_v21 = vunpack.i.h.bf16 %v1197_v20  ;;  %v1198_v22 = vunpack.i.l.bf16 %v1197_v20  ;;  %v766_v20 = vpop.permute.xlu1 %765 }
  0x89   :  { %v1122_v23 = vpack.c.bf16 %v1199_v21, %v1198_v22 }
  0x8a   :  { %v1202_v24 = vpop.permute.xlu0 %1201 }
  0x8b   :  { %v1204_v25 = vunpack.i.h.bf16 %v1202_v24  ;;  %v1203_v26 = vunpack.i.l.bf16 %v1202_v24  ;;  %1123 = vmatpush3.bf16.msra.mxu0 %v1122_v23 }
  0x8c   :  { %1124 = vmatprep.subr.bf16.mxu0 %v1248_v6  ;;  %v1207_v21 = vpop.permute.xlu1 %1206 }
  0x8d   :  { %v1125_v28 = vpack.c.bf16 %v1204_v25, %v1203_v26  ;;  %v1209_v23 = vunpack.i.h.bf16 %v1207_v21  ;;  %v1208_v24 = vunpack.i.l.bf16 %v1207_v21 }
  0x8e   :  { %v1212_v22 = vpop.permute.xlu0 %1211 }
  0x8f   :  { %1126 = vmatpush3.bf16.msra.mxu0 %v1125_v28  ;;  %v1214_v25 = vunpack.i.h.bf16 %v1212_v22  ;;  %v1213_v26 = vunpack.i.l.bf16 %v1212_v22  ;;  %v1166_v28 = vpack.c.bf16 %v1209_v23, %v1208_v24 }
  0x90   :  { %1128 = vmatprep.subr.bf16.mxu0 %v1227_v27  ;;  %v116_v27 = vld [vmem:[%s1575_s3 + $0x1] ss:$0 sm:$0xff] }
  0x91   :  { %235 = vrot.lane.b32.xlu0 %v116_v27, %s1253_s2 }
  0x92   :  { %1091 = vmatmul.mubr.msk.f32.vlgmr.msra.gmra.mrb[2].mxu0 %vm42_vm1, %v465_v29  ;;  %v1462_v33 = vpop.permute.xlu0 %785 }
  0x93   :  { %1130 = vmatpush1.bf16.msra.mxu0 %v1229_v30  ;;  %642 = vmatprep.mubr.f32.mxu0 %v1250_v10 }
  0x94   :  { %1132 = vmatprep.subr.bf16.mxu0 %v1230_v31 }
  0x96   :  { %v1222_v36 = vpop.permute.xlu0 %1221 }
  0x97   :  { %1134 = vmatpush1.bf16.msra.mxu0 %v1232_v32  ;;  %v1224_v39 = vunpack.i.h.bf16 %v1222_v36 }
  0x98   :  { %1165 = vmatprep.subr.bf16.mxu0 %v1248_v6 }
  0x9a   :  { %998 = vmatmul.mubr.msk.f32.vlgmr.msra.gmra.mrb[4].mxu0 %vm42_vm1, %v465_v29  ;;  %v1169_v29 = vpack.c.bf16 %v1214_v25, %v1213_v26 }
  0x9b   :  { %1101 = vmatprep.mubr.msk.f32.mxu0 %vm1249_vm0, %v1250_v10  ;;  %1167 = vmatpush3.bf16.msra.mxu0 %v1166_v28 }
  0x9c   :  { %1168 = vmatprep.subr.bf16.mxu0 %v1248_v6 }
  0x9f   :  { %1170 = vmatpush3.bf16.msra.mxu0 %v1169_v29 }
  0xa0   :  { %1171 = vmatprep.subr.bf16.mxu0 %v1248_v6 }
  0xeb   :  { %v1386_v41 = vpop.f32.mrb[0].mxu0 }
  0xec   :  { %v118_v43 = vcombine.high %v1386_v41, %v1386_v41  ;;  %v125_v44 = vrot.slane %v1386_v41, %v124_v40  ;;  %v1081_v45 = vpop.f32.mrb[1].mxu0 }
  0xee   :  { %v132_v47 = vrot.slane %v118_v43, %v124_v40  ;;  %v133_v48 = vcombine.high %v125_v44, %v125_v44  ;;  %v1398_v49 = vrot.slane %v125_v44, %v124_v40 }
  0xf0   :  { %v134_v51 = vcombine.high %v132_v47, %v132_v47  ;;  %v1403_v52 = vrot.slane %v132_v47, %v124_v40  ;;  %v1405_v53 = vrot.slane %v133_v48, %v124_v40  ;;  %v163_v54 = vcombine.high %v1398_v49, %v1398_v49 }
  0xf1   :  { %v170_v55 = vrot.slane %v1398_v49, %v1395_v46 }
  0xf2   :  { %v1411_v56 = vrot.slane %v134_v51, %v124_v40  ;;  %v164_v57 = vcombine.high %v1403_v52, %v1403_v52  ;;  %v165_v58 = vcombine.high %v1405_v53, %v1405_v53  ;;  %v174_v59 = vrot.slane %v1405_v53, %v1395_v46 }
  0xf3   :  { %v1420_v60 = vrot.slane %v163_v54, %v1395_v46  ;;  %v186_v61 = vrot.slane %v1403_v52, %v1395_v46  ;;  %v1223_v40 = vunpack.i.l.bf16 %v1222_v36 }
  0xf4   :  { %v166_v62 = vcombine.high %v1411_v56, %v1411_v56  ;;  %v182_v63 = vrot.slane %v165_v58, %v1395_v46  ;;  %v190_v0 = vrot.slane %v1411_v56, %v1395_v46  ;;  %v1430_v1 = vrot.slane %v164_v57, %v1395_v46 }
  0xf6   :  { %v1437_v2 = vrot.slane %v166_v62, %v1395_v46 }
 0x103   :  { %v236_v49 = vpop.permute.xlu0 %235 }
 0x165   :  { %v1439_v3 = vpop.f32.mrb[2].mxu0 }
 0x166   :  { %v1092_v4 = vpop.f32.mrb[3].mxu0 }
 0x16d   :  { %v644_v13 = vpop.f32.mrb[4].mxu0 }
 0x16e   :  { %v645_v14 = vadd.f32 %v644_v13, %v571_v9  ;;  %v646_v15 = vpop.f32.mrb[5].mxu0 }
 0x16f   :  { %v647_v16 = vadd.f32 %v646_v15, %v575_v12 }
 0x170   :  { %v649_v19 = vmax.f32 %v645_v14, 0.0 }
 0x171   :  { %v650_v17 = vmax.f32 %v647_v16, 0.0 }
 0x173   :  { %999 = vmatprep.mubr.msk.f32.mxu1 %vm42_vm1, %v650_v17 }
 0x174   :  { %759 = vmatmul.mubr.f32.vlgmr.msra.gmra.mrb[0].mxu1 %v649_v19 }
 0x247   :  { %v760_v30 = vpop.f32.mrb[0].mxu1 }
 0x248   :  { %v1455_v31 = vadd.f32 %v766_v20, %v760_v30  ;;  %v762_v32 = vpop.f32.mrb[1].mxu1 }
 0x24a   :  { %v769_v11 = vmax.f32 %v1455_v31, 0.0 }
 0x24c   :  { %771 = vrot.lane.b32.xlu1 %v769_v11, %s1251_s30 }
 0x250   :  { %1216 = vrot.lane.b32.xlu1 %v1303_v8, %s1254_s12  ;;  %v1175_v8 = vpack.c.bf16 %v1224_v39, %v1223_v40 }
 0x254   :  { %207 = vrot.lane.b32.xlu1 %v1386_v41, %s1253_s2 }
 0x2be   :  { %v772_v34 = vpop.permute.xlu1 %771 }
 0x2bf   :  { %1102 = vmatmul.mubr.msk.f32.vlgmr.msra.gmra.mrb[6].mxu0 %vm42_vm1, %v772_v34 }
 0x2c0   :  { %1112 = vmatprep.mubr.msk.f32.mxu0 %vm1249_vm0, %v1250_v10 }
 0x2c2   :  { %v1217_v37 = vpop.permute.xlu1 %1216 }
 0x2c3   :  { %v1219_v42 = vunpack.i.h.bf16 %v1217_v37  ;;  %v1218_v43 = vunpack.i.l.bf16 %v1217_v37 }
 0x2c5   :  { %v1172_v44 = vpack.c.bf16 %v1219_v42, %v1218_v43 }
 0x2c6   :  { %v208_v45 = vpop.permute.xlu1 %207 }
 0x2c7   :  { %v211_v41 = vadd.f32 %v208_v45, %v174_v59  ;;  %v210_v47 = vadd.f32 %v208_v45, %v170_v55  ;;  %v213_v48 = vadd.f32 %v208_v45, %v182_v63  ;;  %v212_v10 = vadd.f32 %v208_v45, %v1420_v60  ;;  %1173 = vmatpush3.bf16.msra.mxu0 %v1172_v44 }
 0x2c8   :  { %v215_v50 = vadd.f32 %v208_v45, %v190_v0  ;;  %v214_v51 = vadd.f32 %v208_v45, %v186_v61  ;;  %1174 = vmatprep.subr.bf16.mxu0 %v1248_v6  ;;  %v217_v63 = vadd.f32 %v208_v45, %v1437_v2  ;;  %v216_v56 = vadd.f32 %v208_v45, %v1430_v1 }
 0x2c9   :  { %v219_v53 = vadd.f32 %v211_v41, %v116_v27  ;;  %v218_v54 = vadd.f32 %v210_v47, %v116_v27  ;;  %v221_v57 = vadd.f32 %v213_v48, %v116_v27  ;;  %v220_v58 = vadd.f32 %v212_v10, %v116_v27 }
 0x2ca   :  { %v223_v60 = vadd.f32 %v215_v50, %v116_v27  ;;  %v222_v62 = vadd.f32 %v214_v51, %v116_v27  ;;  %v225_v6 = vadd.f32 %v217_v63, %v116_v27  ;;  %v224_v61 = vadd.f32 %v216_v56, %v116_v27 }
 0x2cb   :  { %v227_v55 = vmax.f32 %v219_v53, 0.0  ;;  %v226_v59 = vmax.f32 %v218_v54, 0.0  ;;  %1176 = vmatpush3.bf16.msra.mxu0 %v1175_v8  ;;  %v229_v46 = vmax.f32 %v221_v57, 0.0  ;;  %v228_v52 = vmax.f32 %v220_v58, 0.0 }
 0x2cc   :  { %v231_v9 = vmax.f32 %v223_v60, 0.0  ;;  %v230_v12 = vmax.f32 %v222_v62, 0.0  ;;  %v233_v13 = vmax.f32 %v225_v6, 0.0  ;;  %v232_v14 = vmax.f32 %v224_v61, 0.0 }
 0x2cd   :  { %v239_v0 = vmul.f32 %v236_v49, %v227_v55  ;;  %v238_v4 = vmul.f32 %v236_v49, %v226_v59  ;;  %v241_v5 = vmul.f32 %v236_v49, %v229_v46  ;;  %v240_v7 = vmul.f32 %v236_v49, %v228_v52 }
 0x2ce   :  { %v243_v2 = vmul.f32 %v236_v49, %v231_v9  ;;  %v242_v1 = vmul.f32 %v236_v49, %v230_v12  ;;  %v245_v15 = vmul.f32 %v236_v49, %v233_v13  ;;  %v1489_v16 = vmul.f32 %v236_v49, %v232_v14 }
 0x2cf   :  { %290 = vrot.lane.b32.xlu0 %v239_v0, %s1251_s30  ;;  %288 = vrot.lane.b32.xlu1 %v238_v4, %s1251_s30  ;;  %v246_v36 = vsel %vm42_vm1, %v238_v4, 0.0  ;;  %v249_v37 = vsel %vm42_vm1, %v239_v0, 0.0  ;;  %v252_v39 = vsel %vm42_vm1, %v240_v7, 0.0  ;;  %v255_v40 = vsel %vm42_vm1, %v241_v5, 0.0 }
 0x2d0   :  { %v258_v42 = vsel %vm42_vm1, %v242_v1, 0.0  ;;  %v261_v43 = vsel %vm42_vm1, %v243_v2, 0.0  ;;  %v267_v44 = vsel %vm42_vm1, %v245_v15, 0.0  ;;  %v551_v45 = vadd.f32 %v1439_v3, %v1346_v18 }
 0x2d1   :  { %v861_v8 = vmul.f32 0.3, %v1455_v31  ;;  %v1517_v18 = vand.u32 127, %v122_v35 }
 0x2d2   :  { %v860_v47 = vmul.f32 0.4, %v551_v45 }
 0x2d3   :  { %294 = vrot.lane.b32.xlu0 %v241_v5, %s1251_s30  ;;  %292 = vrot.lane.b32.xlu1 %v240_v7, %s1251_s30  ;;  %v1521_v58 = vsub.s32 %v1517_v18, %v1378_v38  ;;  %vm350_vm10 = vcmp.eq.s32.totalorder %v1378_v38, %v1517_v18 }
 0x2d4   :  { %v862_v50 = vadd.f32 %v861_v8, %v860_v47 }
 0x2d7   :  { %298 = vrot.lane.b32.xlu0 %v243_v2, %s1251_s30  ;;  %296 = vrot.lane.b32.xlu1 %v242_v1, %s1251_s30 }
 0x2db   :  { %302 = vrot.lane.b32.xlu0 %v245_v15, %s1251_s30  ;;  %300 = vrot.lane.b32.xlu1 %v1489_v16, %s1251_s30  ;;  %s996_s30 = sld [smem:[#allocation2 + $0x1]] }
 0x2e1   :  { %v337_v3 = vstv %s996_s30 }
 0x341   :  { %v291_v17 = vpop.permute.xlu0 %290  ;;  %v289_v19 = vpop.permute.xlu1 %288 }
 0x342   :  { %v315_v20 = vsel %vm42_vm1, %v291_v17, 0.0  ;;  %v312_v21 = vsel %vm42_vm1, %v289_v19, 0.0 }
 0x343   :  { %316 = vadd.xlane.f32.xlu0 %v315_v20  ;;  %313 = vadd.xlane.f32.xlu1 %v312_v21 }
 0x345   :  { %v295_v22 = vpop.permute.xlu0 %294  ;;  %v293_v23 = vpop.permute.xlu1 %292 }
 0x346   :  { %v321_v24 = vsel %vm42_vm1, %v295_v22, 0.0  ;;  %v318_v25 = vsel %vm42_vm1, %v293_v23, 0.0 }
 0x347   :  { %322 = vadd.xlane.f32.xlu1 %v321_v24  ;;  %319 = vadd.xlane.f32.xlu0 %v318_v25  ;;  %v271_v25 = vstv %s270_s15 }
 0x349   :  { %v299_v26 = vpop.permute.xlu0 %298  ;;  %v297_v27 = vpop.permute.xlu1 %296 }
 0x34a   :  { %v327_v28 = vsel %vm42_vm1, %v299_v26, 0.0  ;;  %v324_v29 = vsel %vm42_vm1, %v297_v27, 0.0 }
 0x34b   :  { %328 = vadd.xlane.f32.xlu1 %v327_v28  ;;  %325 = vadd.xlane.f32.xlu0 %v324_v29 }
 0x34d   :  { %v303_v30 = vpop.permute.xlu0 %302  ;;  %v301_v32 = vpop.permute.xlu1 %300 }
 0x34e   :  { %v333_v11 = vsel %vm42_vm1, %v303_v30, 0.0  ;;  %v330_v34 = vsel %vm42_vm1, %v301_v32, 0.0 }
 0x34f   :  { %334 = vadd.xlane.f32.xlu1 %v333_v11  ;;  %331 = vadd.xlane.f32.xlu0 %v330_v34 }
 0x353   :  { %247 = vadd.xlane.f32.xlu1 %v246_v36 }
 0x357   :  { %250 = vadd.xlane.f32.xlu1 %v249_v37 }
 0x35b   :  { %253 = vadd.xlane.f32.xlu1 %v252_v39 }
 0x35f   :  { %256 = vadd.xlane.f32.xlu1 %v255_v40 }
 0x363   :  { %259 = vadd.xlane.f32.xlu1 %v258_v42 }
 0x367   :  { %262 = vadd.xlane.f32.xlu1 %v261_v43 }
 0x36b   :  { %268 = vadd.xlane.f32.xlu1 %v267_v44 }
 0x392   :  { %v856_v41 = vpop.f32.mrb[6].mxu0 }
 0x393   :  { %v857_v48 = vadd.f32 %v856_v41, %v1462_v33  ;;  %v1103_v10 = vpop.f32.mrb[7].mxu0 }
 0x395   :  { %v863_v51 = vmul.f32 0.3, %v857_v48 }
 0x397   :  { %v864_v53 = vadd.f32 %v863_v51, %v862_v50 }
 0x399   :  { %v866_v54 = vrot.slane %v864_v53, 4  ;;  %v955_v53 = vld [vmem:[%s1575_s3 + $0x3] ss:$0 sm:$0xff]  ;;  %s1258_s3 = smov 24  }
 0x39b   :  { %v869_v57 = vsel %vm868_vm2, %v1455_v31, %v866_v54 }
 0x39c   :  { %1113 = vmatmul.mubr.msk.f32.vlgmr.msra.gmra.mrb[8].mxu0 %vm42_vm1, %v869_v57 }
 0x3d0   :  { %v317_v33 = vpop.xlane.xlu0 %316  ;;  %v314_v49 = vpop.xlane.xlu1 %313 }
 0x3d1   :  { %v339_v55 = vadd.f32 %v337_v3, %v317_v33  ;;  %v338_v59 = vadd.f32 %v337_v3, %v314_v49  ;;  %v264_v33 = vsel %vm42_vm1, %v1489_v16, 0.0 }
 0x3d3   :  { %v422_v60 = vrot.slane %v339_v55, %v1521_v58  ;;  %v418_v62 = vrot.slane %v338_v59, %v1521_v58 }
 0x3d4   :  { %v320_v31 = vpop.xlane.xlu0 %319  ;;  %v323_v63 = vpop.xlane.xlu1 %322 }
 0x3d5   :  { %v340_v56 = vadd.f32 %v337_v3, %v320_v31  ;;  %v341_v0 = vadd.f32 %v337_v3, %v323_v63  ;;  %v447_v4 = vsel %vm391_vm3, %v422_v60, %v418_v62 }
 0x3d7   :  { %v426_v35 = vrot.slane %v340_v56, %v1521_v58  ;;  %v430_v46 = vrot.slane %v341_v0, %v1521_v58 }
 0x3d8   :  { %v326_v52 = vpop.xlane.xlu0 %325  ;;  %v329_v6 = vpop.xlane.xlu1 %328 }
 0x3d9   :  { %v448_v61 = vsel %vm393_vm4, %v426_v35, %v447_v4  ;;  %v342_v5 = vadd.f32 %v337_v3, %v326_v52  ;;  %v343_v7 = vadd.f32 %v337_v3, %v329_v6 }
 0x3da   :  { %v449_v12 = vsel %vm395_vm5, %v430_v46, %v448_v61 }
 0x3db   :  { %v434_v9 = vrot.slane %v342_v5, %v1521_v58  ;;  %v438_v2 = vrot.slane %v343_v7, %v1521_v58 }
 0x3dc   :  { %v332_v1 = vpop.xlane.xlu0 %331  ;;  %v335_v13 = vpop.xlane.xlu1 %334 }
 0x3dd   :  { %v450_v14 = vsel %vm397_vm6, %v434_v9, %v449_v12  ;;  %v344_v15 = vadd.f32 %v337_v3, %v332_v1  ;;  %v345_v17 = vadd.f32 %v337_v3, %v335_v13 }
 0x3de   :  { %v451_v21 = vsel %vm399_vm7, %v438_v2, %v450_v14 }
 0x3df   :  { %v442_v19 = vrot.slane %v344_v15, %v1521_v58  ;;  %v446_v20 = vrot.slane %v345_v17, %v1521_v58 }
 0x3e0   :  { %v248_v22 = vpop.xlane.xlu1 %247 }
 0x3e1   :  { %v452_v23 = vsel %vm401_vm8, %v442_v19, %v451_v21  ;;  %v272_v29 = vadd.f32 %v271_v25, %v248_v22 }
 0x3e2   :  { %v453_v24 = vsel %vm403_vm9, %v446_v20, %v452_v23 }
 0x3e3   :  { %v455_v26 = vsel %vm350_vm10, 0.0, %v453_v24  ;;  %v362_v34 = vrot.slane %v272_v29, %v1521_v58 }
 0x3e4   :  { %971 = vrot.lane.b32.xlu1 %v455_v26, %s1255_s16  ;;  %v251_v27 = vpop.xlane.xlu1 %250 }
 0x3e5   :  { %v273_v28 = vadd.f32 %v271_v25, %v251_v27 }
 0x3e7   :  { %v366_v30 = vrot.slane %v273_v28, %v1521_v58 }
 0x3e8   :  { %v254_v32 = vpop.xlane.xlu1 %253 }
 0x3e9   :  { %v274_v11 = vadd.f32 %v271_v25, %v254_v32  ;;  %v392_v37 = vsel %vm391_vm3, %v366_v30, %v362_v34 }
 0x3eb   :  { %v370_v36 = vrot.slane %v274_v11, %v1521_v58 }
 0x3ec   :  { %v257_v39 = vpop.xlane.xlu1 %256 }
 0x3ed   :  { %v394_v40 = vsel %vm393_vm4, %v370_v36, %v392_v37  ;;  %v275_v42 = vadd.f32 %v271_v25, %v257_v39 }
 0x3ef   :  { %v374_v43 = vrot.slane %v275_v42, %v1521_v58 }
 0x3f0   :  { %v260_v44 = vpop.xlane.xlu1 %259 }
 0x3f1   :  { %v396_v45 = vsel %vm395_vm5, %v374_v43, %v394_v40  ;;  %v276_v8 = vadd.f32 %v271_v25, %v260_v44 }
 0x3f3   :  { %v378_v41 = vrot.slane %v276_v8, %v1521_v58 }
 0x3f4   :  { %v263_v47 = vpop.xlane.xlu1 %262 }
 0x3f5   :  { %v398_v48 = vsel %vm397_vm6, %v378_v41, %v396_v45  ;;  %v277_v10 = vadd.f32 %v271_v25, %v263_v47 }
 0x3f7   :  { %v382_v50 = vrot.slane %v277_v10, %v1521_v58 }
 0x3f8   :  { %v269_v0 = vpop.xlane.xlu1 %268 }
 0x3f9   :  { %v400_v51 = vsel %vm399_vm7, %v382_v50, %v398_v48  ;;  %v279_v35 = vadd.f32 %v271_v25, %v269_v0 }
 0x3fb   :  { %v390_v46 = vrot.slane %v279_v35, %v1521_v58 }
 0x456   :  { %v972_v52 = vpop.permute.xlu1 %971 }
 0x46f   :  { %v951_v54 = vpop.f32.mrb[8].mxu0 }
 0x470   :  { %v956_v57 = vadd.f32 %v955_v53, %v951_v54  ;;  %v1114_v3 = vpop.f32.mrb[9].mxu0 }
 0x472   :  { %958 = vrot.lane.b32.xlu0 %v956_v57, %s1256_s19  ;;  %v968_v62 = vsel %vm967_vm12, %v956_v57, 0.0 }
 0x473   :  { %v969_v31 = vsel %vm868_vm2, %v968_v62, 0.0 }
 0x491   :  { %265 = vadd.xlane.f32.xlu0 %v264_v33 }
 0x4e4   :  { %v959_v49 = vpop.permute.xlu0 %958 }
 0x4e5   :  { %v962_v55 = vsel %vm961_vm11, %v959_v49, 0.0 }
 0x4e6   :  { %v964_v59 = vrot.slane %v962_v55, 4 }
 0x4e8   :  { %v966_v60 = vsel %vm868_vm2, %v964_v59, 0.0 }
 0x4e9   :  { %975 = vrot.lane.b32.xlu1 %v966_v60, %s1257_s20 }
 0x4ed   :  { %979 = vrot.lane.b32.xlu1 %v969_v31, %s1258_s3 }
 0x51e   :  { %v266_v63 = vpop.xlane.xlu0 %265 }
 0x51f   :  { %v278_v56 = vadd.f32 %v271_v25, %v266_v63 }
 0x521   :  { %v386_v16 = vrot.slane %v278_v56, %v1521_v58 }
 0x523   :  { %v402_v4 = vsel %vm401_vm8, %v386_v16, %v400_v51 }
 0x524   :  { %v404_v6 = vsel %vm403_vm9, %v390_v46, %v402_v4 }
 0x525   :  { %v406_v5 = vsel %vm350_vm10, 0.0, %v404_v6 }
 0x526   :  { %v983_v7 = vsel %vm982_vm13, %v406_v5, %v972_v52 }
 0x55b   :  { %v976_v61 = vpop.permute.xlu1 %975 }
 0x55c   :  { %v985_v9 = vsel %vm984_vm14, %v983_v7, %v976_v61 }
 0x55f   :  { %v980_v12 = vpop.permute.xlu1 %979 }
 0x560   :  { %v987_v2 = vsel %vm986_vm15, %v985_v9, %v980_v12 }
 0x561   :  { %v988_v1 = vsel %vm42_vm1, %v987_v2, 0.0 }
 0x562   :  { %989 = vst [vmem:[%s1577_s5] sm:$0xff] %v988_v1 }
 0x563   :  { %994 = vsyncpa [#allocation3], 1 }

</bundles_post_ra>
